<compile_context>
chip_gen: v5e
topology: v5e:2x2
jax: 0.10.0
libtpu: 0.0.40
codegen_flags: <defaults>
</compile_context>

<pallas_src>
import functools

import jax
import jax.numpy as jnp
from jax import lax
from jax.experimental import pallas as pl
from jax.experimental.pallas import tpu as pltpu

NEG_BIG = -1e30  # finite "-inf" sentinel (0 * NEG_BIG == 0, exp(0) == 1)


def _round_up(x, m):
    return (x + m - 1) // m * m


# --------------------------------------------------------------------------
# Kernel: one MultiSAGEConv layer, edge-tiled, single flash-style pass.
# --------------------------------------------------------------------------
def _multisage_conv_kernel(
        # edge-tiled inputs
        ctx_ref, g_src_ref, g_dst_ref,
        # resident (constant-index) inputs
        z_src_ref, h_dst_ref, a_src_ref, a_dst_ref,
        wa_ctx_ref, ww_n_ref, ww_t_ref, wb_ref,
        # output
        out_ref,
        # scratch
        m_scr, denom_scr, ns_scr, ts_scr,
        *, n_edges: int):
    f32 = jnp.float32
    t = pl.program_id(0)
    n_tiles = pl.num_programs(0)

    @pl.when(t == 0)
    def _init():
        m_scr[...] = jnp.full(m_scr.shape, NEG_BIG, f32)
        denom_scr[...] = jnp.zeros(denom_scr.shape, f32)
        ns_scr[...] = jnp.zeros(ns_scr.shape, f32)
        ts_scr[...] = jnp.zeros(ts_scr.shape, f32)

    # ---- per-edge-tile compute -------------------------------------------
    # bf16 one-hots are fed straight to the dots (exact for 0/1 values);
    # promotion to the f32 accumulate is handled inside the dot lowering.
    g_s = g_src_ref[...]                                 # [TE, Ns]  one-hot(src)
    g_d = g_dst_ref[...]                                 # [TE, Nd]  one-hot(dst)
    z_c = jnp.maximum(ctx_ref[...], 0.0)                 # [TE, D]   act(context)

    # Gather per-edge node features and precomputed per-node attention logits.
    zs_e = jnp.dot(g_s, z_src_ref[...], preferred_element_type=f32)    # [TE, D]
    zt_e = jnp.dot(g_d, h_dst_ref[...], preferred_element_type=f32)    # [TE, D]
    s = (jnp.dot(g_s, a_src_ref[...], preferred_element_type=f32)
         + jnp.dot(g_d, a_dst_ref[...], preferred_element_type=f32)
         + jnp.dot(z_c, wa_ctx_ref[...], preferred_element_type=f32))  # [TE, H]
    s = jnp.where(s > 0, s, 0.01 * s)                    # leaky_relu
    num_heads = s.shape[1]

    # Per-destination (segment) running max, per head -- matches the
    # reference's masked max numerics.  Padded edge rows have g_d == 0 and are
    # excluded by the mask.
    tmax_rows = [
        jnp.max(jnp.where(g_d > 0, s[:, h:h + 1], NEG_BIG),
                axis=0, keepdims=True)                   # [1, Nd]
        for h in range(num_heads)
    ]
    tile_max = jnp.transpose(jnp.concatenate(tmax_rows, axis=0))        # [Nd, H]

    m_old = m_scr[...]
    m_new = jnp.maximum(m_old, tile_max)
    rescale = jnp.exp(m_old - m_new)                     # [Nd, H] (exp(0)=1 safe)
    m_scr[...] = m_new

    # Per-edge shift (gather of m_new over dst) and unnormalized weights.
    m_e = jnp.dot(g_d, m_new, preferred_element_type=f32)               # [TE, H]
    p = jnp.exp(s - m_e)                                                 # [TE, H]

    # Denominator segment sum (all heads at once).  Padded rows: g_d == 0.
    denom_scr[...] = denom_scr[...] * rescale + jnp.einsum(
        "en,eh->nh", g_d, p, preferred_element_type=f32)

    # Unnormalized per-head message accumulators (segment sums over dst).
    zsc = zs_e * z_c                                     # [TE, D]
    ztc = zt_e * z_c                                     # [TE, D]
    for h in range(num_heads):
        p_h = p[:, h:h + 1]                              # [TE, 1]
        r_h = rescale[:, h:h + 1]                        # [Nd, 1]
        ns_scr[h] = ns_scr[h] * r_h + jnp.einsum(
            "en,ed->nd", g_d, zsc * p_h, preferred_element_type=f32)
        ts_scr[h] = ts_scr[h] * r_h + jnp.einsum(
            "en,ed->nd", g_d, ztc * p_h, preferred_element_type=f32)

    @pl.when(t == n_tiles - 1)
    def _finalize():
        denom = denom_scr[...]                           # [Nd, H]
        inv_den = jnp.where(denom > 0.0, 1.0 / denom, 0.0)   # exact reciprocal
        neighbor = ns_scr[0] * inv_den[:, 0:1]
        target = ts_scr[0] * inv_den[:, 0:1]
        for h in range(1, num_heads):
            neighbor = neighbor + ns_scr[h] * inv_den[:, h:h + 1]
            target = target + ts_scr[h] * inv_den[:, h:h + 1]
        scale = 1.0 / (n_edges * num_heads)              # mean over heads, /E
        neighbor = neighbor * scale
        target = target * scale
        # z = relu(W . concat(neighbor, target))  (W split -> no lane concat)
        z = (jnp.dot(neighbor, ww_n_ref[...], preferred_element_type=f32)
             + jnp.dot(target, ww_t_ref[...], preferred_element_type=f32)
             + wb_ref[...])
        z = jnp.maximum(z, 0.0)
        # Row-wise L2 normalize with zero-norm guard (EUP rsqrt).
        z_sq = jnp.sum(z * z, axis=1, keepdims=True)
        inv_norm = jnp.where(z_sq > 0.0, lax.rsqrt(z_sq), 1.0)
        out_ref[...] = z * inv_norm


# --------------------------------------------------------------------------
# Wrapper: per-node precompute + BlockSpecs / grid / scratch for one layer.
# --------------------------------------------------------------------------
def multisage_conv(h_src, h_dst, ctx, g_src, g_dst, params, *, edge_tile=256):
    f32 = jnp.float32
    n_src, d = h_src.shape
    n_dst = h_dst.shape[0]
    n_edges = g_src.shape[0]
    num_heads = params["wa_src"].shape[1]
    d_out = params["ww_n"].shape[1]

    # Hoisted per-node precompute (plain XLA): Q projection + per-node
    # attention logits.  Dropout is eval-mode identity.
    z_src = jnp.maximum(h_src @ params["qw"] + params["qb"], 0.0)   # [Ns, D]
    a_src = z_src @ params["wa_src"]                                # [Ns, H]
    a_dst = h_dst @ params["wa_dst"]                                # [Nd, H]

    # Edge tile: big by default (pipeline overhead amortization), multiple of
    # 32 (bf16 sublane packing), shrunk for tiny graphs to avoid over-padding.
    te = _round_up(min(edge_tile, _round_up(n_edges, 32)), 32)
    n_tiles = pl.cdiv(n_edges, te)
    e_pad = n_tiles * te
    if e_pad != n_edges:
        pad = e_pad - n_edges
        ctx = jnp.pad(ctx, ((0, pad), (0, 0)))
        g_src = jnp.pad(g_src, ((0, pad), (0, 0)))
        g_dst = jnp.pad(g_dst, ((0, pad), (0, 0)))

    # One-hot graph matrices are exact in bf16: halves their HBM/DMA bytes.
    g_src = g_src.astype(jnp.bfloat16)
    g_dst = g_dst.astype(jnp.bfloat16)

    def edge_spec(last):   # edge-tiled, double-buffered stream
        return pl.BlockSpec((te, last), lambda t: (t, 0))

    def whole(shape):      # resident block (constant index map)
        return pl.BlockSpec(shape, lambda t: (0,) * len(shape))

    in_specs = [
        edge_spec(d),                       # ctx (per-edge context)
        edge_spec(n_src),                   # g_src one-hot (bf16)
        edge_spec(n_dst),                   # g_dst one-hot (bf16)
        whole((n_src, d)),                  # z_src = relu(Q h_src)
        whole((n_dst, d)),                  # h_dst
        whole((n_src, num_heads)),          # a_src = z_src @ wa_src
        whole((n_dst, num_heads)),          # a_dst = h_dst @ wa_dst
        whole((d, num_heads)),              # wa_ctx
        whole((d, d_out)),                  # ww_n
        whole((d, d_out)),                  # ww_t
        whole((1, d_out)),                  # wb
    ]
    out_spec = pl.BlockSpec((n_dst, d_out), lambda t: (0, 0))

    # Cost estimate for the single-pass edge stream.
    flops = (2 * e_pad * n_src * d                           # zs_e gather
             + 2 * e_pad * n_dst * d                         # zt_e gather
             + 2 * e_pad * (n_src + n_dst + d) * num_heads   # score terms
             + 2 * e_pad * n_dst * num_heads * 2             # m gather + denom
             + 2 * 2 * num_heads * e_pad * n_dst * d         # ns/ts segment sums
             + 2 * 2 * n_dst * d * d_out)                    # finalize W proj
    transcendentals = e_pad * num_heads + 2 * n_tiles * n_dst * num_heads
    bytes_accessed = (4 * ctx.size                           # streamed once
                      + 2 * (g_src.size + g_dst.size)        # bf16 one-hots
                      + 4 * (z_src.size + h_dst.size + a_src.size + a_dst.size)
                      + 4 * (params["wa_ctx"].size + params["ww_n"].size
                             + params["ww_t"].size + params["wb"].size)
                      + 4 * n_dst * d_out)
    cost = pl.CostEstimate(flops=int(flops),
                           transcendentals=int(transcendentals),
                           bytes_accessed=int(bytes_accessed))

    kernel = functools.partial(_multisage_conv_kernel, n_edges=n_edges)
    return pl.pallas_call(
        kernel,
        out_shape=jax.ShapeDtypeStruct((n_dst, d_out), f32),
        grid_spec=pltpu.PrefetchScalarGridSpec(
            num_scalar_prefetch=0,
            grid=(n_tiles,),                              # edge tiles (reduction)
            in_specs=in_specs,
            out_specs=out_spec,
            scratch_shapes=[
                pltpu.VMEM((n_dst, num_heads), f32),        # per-dst running max
                pltpu.VMEM((n_dst, num_heads), f32),        # per-dst denominators
                pltpu.VMEM((num_heads, n_dst, d), f32),     # neighbor accumulators
                pltpu.VMEM((num_heads, n_dst, d), f32),     # target accumulators
            ]),
        compiler_params=pltpu.CompilerParams(
            dimension_semantics=("arbitrary",),
            # 48 MiB fits the v7x 64 MiB part with headroom; v5e/v6e (128 MiB)
            # could go higher -- the edge_tile knob is what scales with it.
            vmem_limit_bytes=48 * 1024 * 1024),
        cost_estimate=cost,
    )(ctx, g_src, g_dst, z_src, h_dst, a_src, a_dst,
      params["wa_ctx"], params["ww_n"], params["ww_t"], params["wb"])


def multisage_net(h, blocks, context_blocks, params_list):
    # MultiSAGENet.forward (attn_index=None path)
    for (g_src, g_dst), ctx, params in zip(blocks, context_blocks, params_list):
        n_dst = g_dst.shape[1]
        h_dst = h[:n_dst]
        h = multisage_conv(h, h_dst, ctx, g_src, g_dst, params)
    return h


# --------------------------------------------------------------------------
# Parameter init (deterministic, mirrors the torch __init__ shapes/gains).
# --------------------------------------------------------------------------
def init_conv_params(key, d, num_heads):
    k0, k1, k2 = jax.random.split(key, 3)
    gain = jnp.sqrt(2.0)                             # calculate_gain('relu')
    bq = gain * jnp.sqrt(6.0 / (d + d))              # Q: Linear(d, d)
    qw = jax.random.uniform(k0, (d, d), jnp.float32, -bq, bq)
    qb = jnp.zeros((1, d), jnp.float32)
    bw = gain * jnp.sqrt(6.0 / (2 * d + d))          # W: Linear(2d, d)
    ww = jax.random.uniform(k1, (2 * d, d), jnp.float32, -bw, bw)
    wb = jnp.zeros((1, d), jnp.float32)
    sa = gain * jnp.sqrt(2.0 / (3 * d + 1))          # heads: Linear(3d, 1)
    wa = sa * jax.random.normal(k2, (3 * d, num_heads), jnp.float32)
    return dict(qw=qw, qb=qb,
                wa_src=wa[:d], wa_dst=wa[d:2 * d], wa_ctx=wa[2 * d:],
                ww_n=ww[:d], ww_t=ww[d:], wb=wb)


def make_block(key, n_src, n_dst, n_edges):
    src = jax.random.randint(key, (n_edges,), 0, n_src)
    dst = jnp.arange(n_edges) % n_dst                # every dst has >=1 edge
    g_src = jax.nn.one_hot(src, n_src, dtype=jnp.float32)
    g_dst = jax.nn.one_hot(dst, n_dst, dtype=jnp.float32)
    return g_src, g_dst


# --------------------------------------------------------------------------
# Pure-JAX reference (same module semantics) for the correctness check.
# --------------------------------------------------------------------------
def conv_ref(h_src, h_dst, ctx, g_src, g_dst, p):
    z_src = jnp.maximum(h_src @ p["qw"] + p["qb"], 0.0)
    z_c = jnp.maximum(ctx, 0.0)
    zs_e = g_src @ z_src
    zt_e = g_dst @ h_dst
    s = zs_e @ p["wa_src"] + zt_e @ p["wa_dst"] + z_c @ p["wa_ctx"]
    s = jnp.where(s > 0, s, 0.01 * s)
    e_count, num_heads = s.shape
    attn = jnp.zeros((e_count, 1), jnp.float32)
    for hh in range(num_heads):
        s_h = s[:, hh:hh + 1]
        masked = jnp.where(g_dst > 0, s_h, NEG_BIG)
        m = jnp.max(masked, axis=0, keepdims=True)
        m_e = jnp.sum(g_dst * m, axis=1, keepdims=True)
        pe = jnp.exp(s_h - m_e)
        den = jnp.sum(g_dst * pe, axis=0, keepdims=True)
        den_e = jnp.sum(g_dst * den, axis=1, keepdims=True)
        attn = attn + pe / den_e
    attn = attn / num_heads
    neigh = g_dst.T @ (zs_e * z_c * attn) / e_count
    targ = g_dst.T @ (zt_e * z_c * attn) / e_count
    z = jnp.maximum(neigh @ p["ww_n"] + targ @ p["ww_t"] + p["wb"], 0.0)
    n = jnp.sqrt(jnp.sum(z * z, axis=1, keepdims=True))
    n = jnp.where(n == 0.0, 1.0, n)
    return z / n


def net_ref(h, blocks, context_blocks, params_list):
    for (g_src, g_dst), ctx, params in zip(blocks, context_blocks, params_list):
        h = conv_ref(h, h[:g_dst.shape[1]], ctx, g_src, g_dst, params)
    return h


if __name__ == "__main__":
    key = jax.random.PRNGKey(0)
    D, HEADS = 32, 2
    ks = jax.random.split(key, 8)

    # layer 0: 16 src nodes -> 8 dst nodes, 32 edges
    # layer 1:  8 src nodes -> 8 dst nodes, 16 edges
    blocks = [make_block(ks[0], 16, 8, 32), make_block(ks[1], 8, 8, 16)]
    context_blocks = [jax.random.normal(ks[2], (32, D), jnp.float32),
                      jax.random.normal(ks[3], (16, D), jnp.float32)]
    params_list = [init_conv_params(ks[4], D, HEADS),
                   init_conv_params(ks[5], D, HEADS)]
    h0 = jax.random.normal(ks[6], (16, D), jnp.float32)

    out = multisage_net(h0, blocks, context_blocks, params_list)
    out = jax.block_until_ready(out)

    ref = net_ref(h0, blocks, context_blocks, params_list)
    assert out.shape == (8, D)
    assert jnp.allclose(out, ref, atol=5e-3, rtol=5e-3), "kernel/reference mismatch"
    print("KERNEL_OK")
</pallas_src>

<mosaic_0001>
module attributes {stable_mosaic.version = 11 : i64} {
  func.func @_multisage_conv_kernel(%arg0: i32, %arg1: memref<32x32xf32, #tpu.memory_space<vmem>>, %arg2: memref<32x16xbf16, #tpu.memory_space<vmem>>, %arg3: memref<32x8xbf16, #tpu.memory_space<vmem>>, %arg4: memref<16x32xf32, #tpu.memory_space<vmem>>, %arg5: memref<8x32xf32, #tpu.memory_space<vmem>>, %arg6: memref<16x2xf32, #tpu.memory_space<vmem>>, %arg7: memref<8x2xf32, #tpu.memory_space<vmem>>, %arg8: memref<32x2xf32, #tpu.memory_space<vmem>>, %arg9: memref<32x32xf32, #tpu.memory_space<vmem>>, %arg10: memref<32x32xf32, #tpu.memory_space<vmem>>, %arg11: memref<1x32xf32, #tpu.memory_space<vmem>>, %arg12: memref<8x32xf32, #tpu.memory_space<vmem>>, %arg13: memref<8x2xf32, #tpu.memory_space<vmem>>, %arg14: memref<8x2xf32, #tpu.memory_space<vmem>>, %arg15: memref<2x8x32xf32, #tpu.memory_space<vmem>>, %arg16: memref<2x8x32xf32, #tpu.memory_space<vmem>>) attributes {dimension_semantics = [#tpu.dimension_semantics<arbitrary>], iteration_bounds = array<i64: 1>, scalar_prefetch = 0 : i64, scratch_operands = 4 : i64, tpu.core_type = #tpu.core_type<tc>, window_params = [{transform_indices = @transform_0, window_bounds = array<i64: 32, 32>}, {transform_indices = @transform_1, window_bounds = array<i64: 32, 16>}, {transform_indices = @transform_2, window_bounds = array<i64: 32, 8>}, {pipeline_mode = #tpu.pipeline_mode<synchronous>, transform_indices = @transform_3, window_bounds = array<i64: 16, 32>}, {pipeline_mode = #tpu.pipeline_mode<synchronous>, transform_indices = @transform_4, window_bounds = array<i64: 8, 32>}, {pipeline_mode = #tpu.pipeline_mode<synchronous>, transform_indices = @transform_5, window_bounds = array<i64: 16, 2>}, {pipeline_mode = #tpu.pipeline_mode<synchronous>, transform_indices = @transform_6, window_bounds = array<i64: 8, 2>}, {pipeline_mode = #tpu.pipeline_mode<synchronous>, transform_indices = @transform_7, window_bounds = array<i64: 32, 2>}, {pipeline_mode = #tpu.pipeline_mode<synchronous>, transform_indices = @transform_8, window_bounds = array<i64: 32, 32>}, {pipeline_mode = #tpu.pipeline_mode<synchronous>, transform_indices = @transform_9, window_bounds = array<i64: 32, 32>}, {pipeline_mode = #tpu.pipeline_mode<synchronous>, transform_indices = @transform_10, window_bounds = array<i64: 1, 32>}, {pipeline_mode = #tpu.pipeline_mode<synchronous>, transform_indices = @transform_11, window_bounds = array<i64: 8, 32>}]} {
    %c0_i32 = arith.constant 0 : i32
    %0 = arith.cmpi eq, %arg0, %c0_i32 : i32
    %1 = arith.extui %0 : i1 to i32
    %c0_i32_0 = arith.constant 0 : i32
    %2 = arith.cmpi ne, %1, %c0_i32_0 : i32
    scf.if %2 {
      %cst_68 = arith.constant -1.000000e+30 : f32
      %111 = vector.broadcast %cst_68 : f32 to vector<8x2xf32>
      %c0_69 = arith.constant 0 : index
      %c0_70 = arith.constant 0 : index
      %112 = vector.load %arg13[%c0_69, %c0_70] : memref<8x2xf32, #tpu.memory_space<vmem>>, vector<8x2xf32>
      tpu.vector_store %arg13[%c0_69, %c0_70], %111 {strides = array<i32>} : memref<8x2xf32, #tpu.memory_space<vmem>>, vector<8x2xf32>,
      %cst_71 = arith.constant 0.000000e+00 : f32
      %113 = vector.broadcast %cst_71 : f32 to vector<8x2xf32>
      %c0_72 = arith.constant 0 : index
      %c0_73 = arith.constant 0 : index
      %114 = vector.load %arg14[%c0_72, %c0_73] : memref<8x2xf32, #tpu.memory_space<vmem>>, vector<8x2xf32>
      tpu.vector_store %arg14[%c0_72, %c0_73], %113 {strides = array<i32>} : memref<8x2xf32, #tpu.memory_space<vmem>>, vector<8x2xf32>,
      %cst_74 = arith.constant 0.000000e+00 : f32
      %115 = vector.broadcast %cst_74 : f32 to vector<2x8x32xf32>
      %c0_75 = arith.constant 0 : index
      %c0_76 = arith.constant 0 : index
      %c0_77 = arith.constant 0 : index
      %116 = vector.load %arg15[%c0_75, %c0_76, %c0_77] : memref<2x8x32xf32, #tpu.memory_space<vmem>>, vector<2x8x32xf32>
      tpu.vector_store %arg15[%c0_75, %c0_76, %c0_77], %115 {strides = array<i32>} : memref<2x8x32xf32, #tpu.memory_space<vmem>>, vector<2x8x32xf32>,
      %cst_78 = arith.constant 0.000000e+00 : f32
      %117 = vector.broadcast %cst_78 : f32 to vector<2x8x32xf32>
      %c0_79 = arith.constant 0 : index
      %c0_80 = arith.constant 0 : index
      %c0_81 = arith.constant 0 : index
      %118 = vector.load %arg16[%c0_79, %c0_80, %c0_81] : memref<2x8x32xf32, #tpu.memory_space<vmem>>, vector<2x8x32xf32>
      tpu.vector_store %arg16[%c0_79, %c0_80, %c0_81], %117 {strides = array<i32>} : memref<2x8x32xf32, #tpu.memory_space<vmem>>, vector<2x8x32xf32>,
    } else {
    }
    %c0 = arith.constant 0 : index
    %c0_1 = arith.constant 0 : index
    %3 = vector.load %arg2[%c0, %c0_1] : memref<32x16xbf16, #tpu.memory_space<vmem>>, vector<32x16xbf16>
    %c0_2 = arith.constant 0 : index
    %c0_3 = arith.constant 0 : index
    %4 = vector.load %arg3[%c0_2, %c0_3] : memref<32x8xbf16, #tpu.memory_space<vmem>>, vector<32x8xbf16>
    %c0_4 = arith.constant 0 : index
    %c0_5 = arith.constant 0 : index
    %5 = vector.load %arg1[%c0_4, %c0_5] : memref<32x32xf32, #tpu.memory_space<vmem>>, vector<32x32xf32>
    %cst = arith.constant 0.000000e+00 : f32
    %6 = vector.broadcast %cst : f32 to vector<32x32xf32>
    %7 = arith.maximumf %5, %6 : vector<32x32xf32>
    %c0_6 = arith.constant 0 : index
    %c0_7 = arith.constant 0 : index
    %8 = vector.load %arg4[%c0_6, %c0_7] : memref<16x32xf32, #tpu.memory_space<vmem>>, vector<16x32xf32>
    %cst_8 = arith.constant dense<0.000000e+00> : vector<32x32xf32>
    %9 = tpu.matmul %3, %8, %cst_8 {dimension_numbers = #tpu.dot_dimension_numbers<[1], [0], [0], [1], [0, 0, 1, 1], [], []>} : vector<32x16xbf16>, vector<16x32xf32>, vector<32x32xf32> -> vector<32x32xf32>
    %c0_9 = arith.constant 0 : index
    %c0_10 = arith.constant 0 : index
    %10 = vector.load %arg5[%c0_9, %c0_10] : memref<8x32xf32, #tpu.memory_space<vmem>>, vector<8x32xf32>
    %cst_11 = arith.constant dense<0.000000e+00> : vector<32x32xf32>
    %11 = tpu.matmul %4, %10, %cst_11 {dimension_numbers = #tpu.dot_dimension_numbers<[1], [0], [0], [1], [0, 0, 1, 1], [], []>} : vector<32x8xbf16>, vector<8x32xf32>, vector<32x32xf32> -> vector<32x32xf32>
    %c0_12 = arith.constant 0 : index
    %c0_13 = arith.constant 0 : index
    %12 = vector.load %arg6[%c0_12, %c0_13] : memref<16x2xf32, #tpu.memory_space<vmem>>, vector<16x2xf32>
    %cst_14 = arith.constant dense<0.000000e+00> : vector<32x2xf32>
    %13 = tpu.matmul %3, %12, %cst_14 {dimension_numbers = #tpu.dot_dimension_numbers<[1], [0], [0], [1], [0, 0, 1, 1], [], []>} : vector<32x16xbf16>, vector<16x2xf32>, vector<32x2xf32> -> vector<32x2xf32>
    %c0_15 = arith.constant 0 : index
    %c0_16 = arith.constant 0 : index
    %14 = vector.load %arg7[%c0_15, %c0_16] : memref<8x2xf32, #tpu.memory_space<vmem>>, vector<8x2xf32>
    %cst_17 = arith.constant dense<0.000000e+00> : vector<32x2xf32>
    %15 = tpu.matmul %4, %14, %cst_17 {dimension_numbers = #tpu.dot_dimension_numbers<[1], [0], [0], [1], [0, 0, 1, 1], [], []>} : vector<32x8xbf16>, vector<8x2xf32>, vector<32x2xf32> -> vector<32x2xf32>
    %16 = arith.addf %13, %15 : vector<32x2xf32>
    %c0_18 = arith.constant 0 : index
    %c0_19 = arith.constant 0 : index
    %17 = vector.load %arg8[%c0_18, %c0_19] : memref<32x2xf32, #tpu.memory_space<vmem>>, vector<32x2xf32>
    %cst_20 = arith.constant dense<0.000000e+00> : vector<32x2xf32>
    %18 = tpu.matmul %7, %17, %cst_20 {dimension_numbers = #tpu.dot_dimension_numbers<[1], [0], [0], [1], [0, 0, 1, 1], [], []>} : vector<32x32xf32>, vector<32x2xf32>, vector<32x2xf32> -> vector<32x2xf32>
    %19 = arith.addf %16, %18 : vector<32x2xf32>
    %cst_21 = arith.constant 0.000000e+00 : f32
    %20 = vector.broadcast %cst_21 : f32 to vector<32x2xf32>
    %21 = arith.cmpf ogt, %19, %20 : vector<32x2xf32>
    %cst_22 = arith.constant 0.00999999977 : f32
    %22 = vector.broadcast %cst_22 : f32 to vector<32x2xf32>
    %23 = arith.mulf %22, %19 : vector<32x2xf32>
    %24 = arith.select %21, %19, %23 : vector<32x2xi1>, vector<32x2xf32>
    %cst_23 = arith.constant 0.000000e+00 : bf16
    %25 = vector.broadcast %cst_23 : bf16 to vector<32x8xbf16>
    %26 = arith.cmpf ogt, %4, %25 : vector<32x8xbf16>
    %27 = vector.extract_strided_slice %24 {offsets = [0, 0], sizes = [32, 1], strides = [1, 1]} : vector<32x2xf32> to vector<32x1xf32>
    %cst_24 = arith.constant -1.000000e+30 : f32
    %28 = vector.shape_cast %27 : vector<32x1xf32> to vector<32x1xf32>
    %29 = vector.broadcast %28 : vector<32x1xf32> to vector<32x8xf32>
    %30 = vector.broadcast %cst_24 : f32 to vector<32x8xf32>
    %31 = arith.select %26, %29, %30 : vector<32x8xi1>, vector<32x8xf32>
    %cst_25 = arith.constant dense<0xFF800000> : vector<8xf32>
    %32 = vector.multi_reduction <maximumf>, %31, %cst_25 [0] : vector<32x8xf32> to vector<8xf32>
    %33 = vector.shape_cast %32 : vector<8xf32> to vector<1x8xf32>
    %cst_26 = arith.constant 0.000000e+00 : bf16
    %34 = vector.broadcast %cst_26 : bf16 to vector<32x8xbf16>
    %35 = arith.cmpf ogt, %4, %34 : vector<32x8xbf16>
    %36 = vector.extract_strided_slice %24 {offsets = [0, 1], sizes = [32, 1], strides = [1, 1]} : vector<32x2xf32> to vector<32x1xf32>
    %cst_27 = arith.constant -1.000000e+30 : f32
    %37 = vector.shape_cast %36 : vector<32x1xf32> to vector<32x1xf32>
    %38 = vector.broadcast %37 : vector<32x1xf32> to vector<32x8xf32>
    %39 = vector.broadcast %cst_27 : f32 to vector<32x8xf32>
    %40 = arith.select %35, %38, %39 : vector<32x8xi1>, vector<32x8xf32>
    %cst_28 = arith.constant dense<0xFF800000> : vector<8xf32>
    %41 = vector.multi_reduction <maximumf>, %40, %cst_28 [0] : vector<32x8xf32> to vector<8xf32>
    %42 = vector.shape_cast %41 : vector<8xf32> to vector<1x8xf32>
    %43 = tpu.concatenate %33, %42 in 0 : vector<1x8xf32>, vector<1x8xf32> -> vector<2x8xf32>
    %44 = tpu.transpose %43, [1, 0] : vector<2x8xf32> -> vector<8x2xf32>
    %c0_29 = arith.constant 0 : index
    %c0_30 = arith.constant 0 : index
    %45 = vector.load %arg13[%c0_29, %c0_30] : memref<8x2xf32, #tpu.memory_space<vmem>>, vector<8x2xf32>
    %46 = arith.maximumf %45, %44 : vector<8x2xf32>
    %47 = arith.subf %45, %46 : vector<8x2xf32>
    %48 = math.exp %47 : vector<8x2xf32>
    %c0_31 = arith.constant 0 : index
    %c0_32 = arith.constant 0 : index
    %49 = vector.load %arg13[%c0_31, %c0_32] : memref<8x2xf32, #tpu.memory_space<vmem>>, vector<8x2xf32>
    tpu.vector_store %arg13[%c0_31, %c0_32], %46 {strides = array<i32>} : memref<8x2xf32, #tpu.memory_space<vmem>>, vector<8x2xf32>,
    %cst_33 = arith.constant dense<0.000000e+00> : vector<32x2xf32>
    %50 = tpu.matmul %4, %46, %cst_33 {dimension_numbers = #tpu.dot_dimension_numbers<[1], [0], [0], [1], [0, 0, 1, 1], [], []>} : vector<32x8xbf16>, vector<8x2xf32>, vector<32x2xf32> -> vector<32x2xf32>
    %51 = arith.subf %24, %50 : vector<32x2xf32>
    %52 = math.exp %51 : vector<32x2xf32>
    %c0_34 = arith.constant 0 : index
    %c0_35 = arith.constant 0 : index
    %53 = vector.load %arg14[%c0_34, %c0_35] : memref<8x2xf32, #tpu.memory_space<vmem>>, vector<8x2xf32>
    %54 = arith.mulf %53, %48 : vector<8x2xf32>
    "tpu.trace_start"() <{level = 10 : i32, message = "en,eh->nh"}> : () -> ()
    %cst_36 = arith.constant dense<0.000000e+00> : vector<8x2xf32>
    %55 = tpu.matmul %4, %52, %cst_36 {dimension_numbers = #tpu.dot_dimension_numbers<[0], [0], [1], [1], [0, 1, 1, 1], [], []>} : vector<32x8xbf16>, vector<32x2xf32>, vector<8x2xf32> -> vector<8x2xf32>
    "tpu.trace_stop"() : () -> ()
    %56 = arith.addf %54, %55 : vector<8x2xf32>
    %c0_37 = arith.constant 0 : index
    %c0_38 = arith.constant 0 : index
    %57 = vector.load %arg14[%c0_37, %c0_38] : memref<8x2xf32, #tpu.memory_space<vmem>>, vector<8x2xf32>
    tpu.vector_store %arg14[%c0_37, %c0_38], %56 {strides = array<i32>} : memref<8x2xf32, #tpu.memory_space<vmem>>, vector<8x2xf32>,
    %58 = arith.mulf %9, %7 : vector<32x32xf32>
    %59 = arith.mulf %11, %7 : vector<32x32xf32>
    %60 = vector.extract_strided_slice %52 {offsets = [0, 0], sizes = [32, 1], strides = [1, 1]} : vector<32x2xf32> to vector<32x1xf32>
    %61 = vector.extract_strided_slice %48 {offsets = [0, 0], sizes = [8, 1], strides = [1, 1]} : vector<8x2xf32> to vector<8x1xf32>
    %c0_39 = arith.constant 0 : index
    %c0_40 = arith.constant 0 : index
    %c0_41 = arith.constant 0 : index
    %62 = vector.load %arg15[%c0_39, %c0_40, %c0_41] : memref<2x8x32xf32, #tpu.memory_space<vmem>>, vector<1x8x32xf32>
    %63 = vector.shape_cast %62 : vector<1x8x32xf32> to vector<8x32xf32>
    %64 = vector.broadcast %61 : vector<8x1xf32> to vector<8x32xf32>
    %65 = arith.mulf %63, %64 : vector<8x32xf32>
    %66 = vector.broadcast %60 : vector<32x1xf32> to vector<32x32xf32>
    %67 = arith.mulf %58, %66 : vector<32x32xf32>
    "tpu.trace_start"() <{level = 10 : i32, message = "en,ed->nd"}> : () -> ()
    %cst_42 = arith.constant dense<0.000000e+00> : vector<8x32xf32>
    %68 = tpu.matmul %4, %67, %cst_42 {dimension_numbers = #tpu.dot_dimension_numbers<[0], [0], [1], [1], [0, 1, 1, 1], [], []>} : vector<32x8xbf16>, vector<32x32xf32>, vector<8x32xf32> -> vector<8x32xf32>
    "tpu.trace_stop"() : () -> ()
    %69 = arith.addf %65, %68 : vector<8x32xf32>
    %c0_43 = arith.constant 0 : index
    %c0_44 = arith.constant 0 : index
    %c0_45 = arith.constant 0 : index
    %70 = vector.load %arg15[%c0_43, %c0_44, %c0_45] : memref<2x8x32xf32, #tpu.memory_space<vmem>>, vector<1x8x32xf32>
    %71 = vector.shape_cast %70 : vector<1x8x32xf32> to vector<8x32xf32>
    %72 = vector.shape_cast %69 : vector<8x32xf32> to vector<1x8x32xf32>
    tpu.vector_store %arg15[%c0_43, %c0_44, %c0_45], %72 {strides = array<i32>} : memref<2x8x32xf32, #tpu.memory_space<vmem>>, vector<1x8x32xf32>,
    %c0_46 = arith.constant 0 : index
    %c0_47 = arith.constant 0 : index
    %c0_48 = arith.constant 0 : index
    %73 = vector.load %arg16[%c0_46, %c0_47, %c0_48] : memref<2x8x32xf32, #tpu.memory_space<vmem>>, vector<1x8x32xf32>
    %74 = vector.shape_cast %73 : vector<1x8x32xf32> to vector<8x32xf32>
    %75 = vector.broadcast %61 : vector<8x1xf32> to vector<8x32xf32>
    %76 = arith.mulf %74, %75 : vector<8x32xf32>
    %77 = vector.broadcast %60 : vector<32x1xf32> to vector<32x32xf32>
    %78 = arith.mulf %59, %77 : vector<32x32xf32>
    "tpu.trace_start"() <{level = 10 : i32, message = "en,ed->nd"}> : () -> ()
    %cst_49 = arith.constant dense<0.000000e+00> : vector<8x32xf32>
    %79 = tpu.matmul %4, %78, %cst_49 {dimension_numbers = #tpu.dot_dimension_numbers<[0], [0], [1], [1], [0, 1, 1, 1], [], []>} : vector<32x8xbf16>, vector<32x32xf32>, vector<8x32xf32> -> vector<8x32xf32>
    "tpu.trace_stop"() : () -> ()
    %80 = arith.addf %76, %79 : vector<8x32xf32>
    %c0_50 = arith.constant 0 : index
    %c0_51 = arith.constant 0 : index
    %c0_52 = arith.constant 0 : index
    %81 = vector.load %arg16[%c0_50, %c0_51, %c0_52] : memref<2x8x32xf32, #tpu.memory_space<vmem>>, vector<1x8x32xf32>
    %82 = vector.shape_cast %81 : vector<1x8x32xf32> to vector<8x32xf32>
    %83 = vector.shape_cast %80 : vector<8x32xf32> to vector<1x8x32xf32>
    tpu.vector_store %arg16[%c0_50, %c0_51, %c0_52], %83 {strides = array<i32>} : memref<2x8x32xf32, #tpu.memory_space<vmem>>, vector<1x8x32xf32>,
    %84 = vector.extract_strided_slice %52 {offsets = [0, 1], sizes = [32, 1], strides = [1, 1]} : vector<32x2xf32> to vector<32x1xf32>
    %85 = vector.extract_strided_slice %48 {offsets = [0, 1], sizes = [8, 1], strides = [1, 1]} : vector<8x2xf32> to vector<8x1xf32>
    %c1 = arith.constant 1 : index
    %c0_53 = arith.constant 0 : index
    %c0_54 = arith.constant 0 : index
    %86 = vector.load %arg15[%c1, %c0_53, %c0_54] : memref<2x8x32xf32, #tpu.memory_space<vmem>>, vector<1x8x32xf32>
    %87 = vector.shape_cast %86 : vector<1x8x32xf32> to vector<8x32xf32>
    %88 = vector.broadcast %85 : vector<8x1xf32> to vector<8x32xf32>
    %89 = arith.mulf %87, %88 : vector<8x32xf32>
    %90 = vector.broadcast %84 : vector<32x1xf32> to vector<32x32xf32>
    %91 = arith.mulf %58, %90 : vector<32x32xf32>
    "tpu.trace_start"() <{level = 10 : i32, message = "en,ed->nd"}> : () -> ()
    %cst_55 = arith.constant dense<0.000000e+00> : vector<8x32xf32>
    %92 = tpu.matmul %4, %91, %cst_55 {dimension_numbers = #tpu.dot_dimension_numbers<[0], [0], [1], [1], [0, 1, 1, 1], [], []>} : vector<32x8xbf16>, vector<32x32xf32>, vector<8x32xf32> -> vector<8x32xf32>
    "tpu.trace_stop"() : () -> ()
    %93 = arith.addf %89, %92 : vector<8x32xf32>
    %c1_56 = arith.constant 1 : index
    %c0_57 = arith.constant 0 : index
    %c0_58 = arith.constant 0 : index
    %94 = vector.load %arg15[%c1_56, %c0_57, %c0_58] : memref<2x8x32xf32, #tpu.memory_space<vmem>>, vector<1x8x32xf32>
    %95 = vector.shape_cast %94 : vector<1x8x32xf32> to vector<8x32xf32>
    %96 = vector.shape_cast %93 : vector<8x32xf32> to vector<1x8x32xf32>
    tpu.vector_store %arg15[%c1_56, %c0_57, %c0_58], %96 {strides = array<i32>} : memref<2x8x32xf32, #tpu.memory_space<vmem>>, vector<1x8x32xf32>,
    %c1_59 = arith.constant 1 : index
    %c0_60 = arith.constant 0 : index
    %c0_61 = arith.constant 0 : index
    %97 = vector.load %arg16[%c1_59, %c0_60, %c0_61] : memref<2x8x32xf32, #tpu.memory_space<vmem>>, vector<1x8x32xf32>
    %98 = vector.shape_cast %97 : vector<1x8x32xf32> to vector<8x32xf32>
    %99 = vector.broadcast %85 : vector<8x1xf32> to vector<8x32xf32>
    %100 = arith.mulf %98, %99 : vector<8x32xf32>
    %101 = vector.broadcast %84 : vector<32x1xf32> to vector<32x32xf32>
    %102 = arith.mulf %59, %101 : vector<32x32xf32>
    "tpu.trace_start"() <{level = 10 : i32, message = "en,ed->nd"}> : () -> ()
    %cst_62 = arith.constant dense<0.000000e+00> : vector<8x32xf32>
    %103 = tpu.matmul %4, %102, %cst_62 {dimension_numbers = #tpu.dot_dimension_numbers<[0], [0], [1], [1], [0, 1, 1, 1], [], []>} : vector<32x8xbf16>, vector<32x32xf32>, vector<8x32xf32> -> vector<8x32xf32>
    "tpu.trace_stop"() : () -> ()
    %104 = arith.addf %100, %103 : vector<8x32xf32>
    %c1_63 = arith.constant 1 : index
    %c0_64 = arith.constant 0 : index
    %c0_65 = arith.constant 0 : index
    %105 = vector.load %arg16[%c1_63, %c0_64, %c0_65] : memref<2x8x32xf32, #tpu.memory_space<vmem>>, vector<1x8x32xf32>
    %106 = vector.shape_cast %105 : vector<1x8x32xf32> to vector<8x32xf32>
    %107 = vector.shape_cast %104 : vector<8x32xf32> to vector<1x8x32xf32>
    tpu.vector_store %arg16[%c1_63, %c0_64, %c0_65], %107 {strides = array<i32>} : memref<2x8x32xf32, #tpu.memory_space<vmem>>, vector<1x8x32xf32>,
    %c0_i32_66 = arith.constant 0 : i32
    %108 = arith.cmpi eq, %arg0, %c0_i32_66 : i32
    %109 = arith.extui %108 : i1 to i32
    %c0_i32_67 = arith.constant 0 : i32
    %110 = arith.cmpi ne, %109, %c0_i32_67 : i32
    scf.if %110 {
      %c0_68 = arith.constant 0 : index
      %c0_69 = arith.constant 0 : index
      %111 = vector.load %arg14[%c0_68, %c0_69] : memref<8x2xf32, #tpu.memory_space<vmem>>, vector<8x2xf32>
      %cst_70 = arith.constant 0.000000e+00 : f32
      %112 = vector.broadcast %cst_70 : f32 to vector<8x2xf32>
      %113 = arith.cmpf ogt, %111, %112 : vector<8x2xf32>
      %cst_71 = arith.constant 1.000000e+00 : f32
      %114 = vector.broadcast %cst_71 : f32 to vector<8x2xf32>
      %115 = arith.divf %114, %111 : vector<8x2xf32>
      %cst_72 = arith.constant 0.000000e+00 : f32
      %116 = vector.broadcast %cst_72 : f32 to vector<8x2xf32>
      %117 = arith.select %113, %115, %116 : vector<8x2xi1>, vector<8x2xf32>
      %c0_73 = arith.constant 0 : index
      %c0_74 = arith.constant 0 : index
      %c0_75 = arith.constant 0 : index
      %118 = vector.load %arg15[%c0_73, %c0_74, %c0_75] : memref<2x8x32xf32, #tpu.memory_space<vmem>>, vector<1x8x32xf32>
      %119 = vector.shape_cast %118 : vector<1x8x32xf32> to vector<8x32xf32>
      %120 = vector.extract_strided_slice %117 {offsets = [0, 0], sizes = [8, 1], strides = [1, 1]} : vector<8x2xf32> to vector<8x1xf32>
      %121 = vector.broadcast %120 : vector<8x1xf32> to vector<8x32xf32>
      %122 = arith.mulf %119, %121 : vector<8x32xf32>
      %c0_76 = arith.constant 0 : index
      %c0_77 = arith.constant 0 : index
      %c0_78 = arith.constant 0 : index
      %123 = vector.load %arg16[%c0_76, %c0_77, %c0_78] : memref<2x8x32xf32, #tpu.memory_space<vmem>>, vector<1x8x32xf32>
      %124 = vector.shape_cast %123 : vector<1x8x32xf32> to vector<8x32xf32>
      %125 = vector.extract_strided_slice %117 {offsets = [0, 0], sizes = [8, 1], strides = [1, 1]} : vector<8x2xf32> to vector<8x1xf32>
      %126 = vector.broadcast %125 : vector<8x1xf32> to vector<8x32xf32>
      %127 = arith.mulf %124, %126 : vector<8x32xf32>
      %c1_79 = arith.constant 1 : index
      %c0_80 = arith.constant 0 : index
      %c0_81 = arith.constant 0 : index
      %128 = vector.load %arg15[%c1_79, %c0_80, %c0_81] : memref<2x8x32xf32, #tpu.memory_space<vmem>>, vector<1x8x32xf32>
      %129 = vector.shape_cast %128 : vector<1x8x32xf32> to vector<8x32xf32>
      %130 = vector.extract_strided_slice %117 {offsets = [0, 1], sizes = [8, 1], strides = [1, 1]} : vector<8x2xf32> to vector<8x1xf32>
      %131 = vector.broadcast %130 : vector<8x1xf32> to vector<8x32xf32>
      %132 = arith.mulf %129, %131 : vector<8x32xf32>
      %133 = arith.addf %122, %132 : vector<8x32xf32>
      %c1_82 = arith.constant 1 : index
      %c0_83 = arith.constant 0 : index
      %c0_84 = arith.constant 0 : index
      %134 = vector.load %arg16[%c1_82, %c0_83, %c0_84] : memref<2x8x32xf32, #tpu.memory_space<vmem>>, vector<1x8x32xf32>
      %135 = vector.shape_cast %134 : vector<1x8x32xf32> to vector<8x32xf32>
      %136 = vector.extract_strided_slice %117 {offsets = [0, 1], sizes = [8, 1], strides = [1, 1]} : vector<8x2xf32> to vector<8x1xf32>
      %137 = vector.broadcast %136 : vector<8x1xf32> to vector<8x32xf32>
      %138 = arith.mulf %135, %137 : vector<8x32xf32>
      %139 = arith.addf %127, %138 : vector<8x32xf32>
      %cst_85 = arith.constant 1.562500e-02 : f32
      %140 = vector.broadcast %cst_85 : f32 to vector<8x32xf32>
      %141 = arith.mulf %133, %140 : vector<8x32xf32>
      %cst_86 = arith.constant 1.562500e-02 : f32
      %142 = vector.broadcast %cst_86 : f32 to vector<8x32xf32>
      %143 = arith.mulf %139, %142 : vector<8x32xf32>
      %c0_87 = arith.constant 0 : index
      %c0_88 = arith.constant 0 : index
      %144 = vector.load %arg9[%c0_87, %c0_88] : memref<32x32xf32, #tpu.memory_space<vmem>>, vector<32x32xf32>
      %cst_89 = arith.constant dense<0.000000e+00> : vector<8x32xf32>
      %145 = tpu.matmul %141, %144, %cst_89 {dimension_numbers = #tpu.dot_dimension_numbers<[1], [0], [0], [1], [0, 0, 1, 1], [], []>} : vector<8x32xf32>, vector<32x32xf32>, vector<8x32xf32> -> vector<8x32xf32>
      %c0_90 = arith.constant 0 : index
      %c0_91 = arith.constant 0 : index
      %146 = vector.load %arg10[%c0_90, %c0_91] : memref<32x32xf32, #tpu.memory_space<vmem>>, vector<32x32xf32>
      %cst_92 = arith.constant dense<0.000000e+00> : vector<8x32xf32>
      %147 = tpu.matmul %143, %146, %cst_92 {dimension_numbers = #tpu.dot_dimension_numbers<[1], [0], [0], [1], [0, 0, 1, 1], [], []>} : vector<8x32xf32>, vector<32x32xf32>, vector<8x32xf32> -> vector<8x32xf32>
      %148 = arith.addf %145, %147 : vector<8x32xf32>
      %c0_93 = arith.constant 0 : index
      %c0_94 = arith.constant 0 : index
      %149 = vector.load %arg11[%c0_93, %c0_94] : memref<1x32xf32, #tpu.memory_space<vmem>>, vector<1x32xf32>
      %150 = vector.broadcast %149 : vector<1x32xf32> to vector<8x32xf32>
      %151 = arith.addf %148, %150 : vector<8x32xf32>
      %cst_95 = arith.constant 0.000000e+00 : f32
      %152 = vector.broadcast %cst_95 : f32 to vector<8x32xf32>
      %153 = arith.maximumf %151, %152 : vector<8x32xf32>
      %154 = arith.mulf %153, %153 : vector<8x32xf32>
      %cst_96 = arith.constant dense<0.000000e+00> : vector<8xf32>
      %155 = vector.multi_reduction <add>, %154, %cst_96 [1] : vector<8x32xf32> to vector<8xf32>
      %156 = vector.shape_cast %155 : vector<8xf32> to vector<8x1xf32>
      %cst_97 = arith.constant 0.000000e+00 : f32
      %157 = vector.broadcast %cst_97 : f32 to vector<8x1xf32>
      %158 = arith.cmpf ogt, %156, %157 : vector<8x1xf32>
      %159 = math.rsqrt %156 : vector<8x1xf32>
      %cst_98 = arith.constant 1.000000e+00 : f32
      %160 = vector.broadcast %cst_98 : f32 to vector<8x1xf32>
      %161 = arith.select %158, %159, %160 : vector<8x1xi1>, vector<8x1xf32>
      %162 = vector.broadcast %161 : vector<8x1xf32> to vector<8x32xf32>
      %163 = arith.mulf %153, %162 : vector<8x32xf32>
      %c0_99 = arith.constant 0 : index
      %c0_100 = arith.constant 0 : index
      %164 = vector.load %arg12[%c0_99, %c0_100] : memref<8x32xf32, #tpu.memory_space<vmem>>, vector<8x32xf32>
      tpu.vector_store %arg12[%c0_99, %c0_100], %163 {strides = array<i32>} : memref<8x32xf32, #tpu.memory_space<vmem>>, vector<8x32xf32>,
    } else {
    }
    return
  }
  func.func @transform_0(%arg0: i32) -> (i32, i32) {
    %c0_i32 = arith.constant 0 : i32
    %c0_i32_0 = arith.constant 0 : i32
    return %arg0, %c0_i32 : i32, i32
  }
  func.func @transform_1(%arg0: i32) -> (i32, i32) {
    %c0_i32 = arith.constant 0 : i32
    %c0_i32_0 = arith.constant 0 : i32
    return %arg0, %c0_i32 : i32, i32
  }
  func.func @transform_2(%arg0: i32) -> (i32, i32) {
    %c0_i32 = arith.constant 0 : i32
    %c0_i32_0 = arith.constant 0 : i32
    return %arg0, %c0_i32 : i32, i32
  }
  func.func @transform_3(%arg0: i32) -> (i32, i32) {
    %c0_i32 = arith.constant 0 : i32
    %c0_i32_0 = arith.constant 0 : i32
    %c0_i32_1 = arith.constant 0 : i32
    return %c0_i32, %c0_i32_0 : i32, i32
  }
  func.func @transform_4(%arg0: i32) -> (i32, i32) {
    %c0_i32 = arith.constant 0 : i32
    %c0_i32_0 = arith.constant 0 : i32
    %c0_i32_1 = arith.constant 0 : i32
    return %c0_i32, %c0_i32_0 : i32, i32
  }
  func.func @transform_5(%arg0: i32) -> (i32, i32) {
    %c0_i32 = arith.constant 0 : i32
    %c0_i32_0 = arith.constant 0 : i32
    %c0_i32_1 = arith.constant 0 : i32
    return %c0_i32, %c0_i32_0 : i32, i32
  }
  func.func @transform_6(%arg0: i32) -> (i32, i32) {
    %c0_i32 = arith.constant 0 : i32
    %c0_i32_0 = arith.constant 0 : i32
    %c0_i32_1 = arith.constant 0 : i32
    return %c0_i32, %c0_i32_0 : i32, i32
  }
  func.func @transform_7(%arg0: i32) -> (i32, i32) {
    %c0_i32 = arith.constant 0 : i32
    %c0_i32_0 = arith.constant 0 : i32
    %c0_i32_1 = arith.constant 0 : i32
    return %c0_i32, %c0_i32_0 : i32, i32
  }
  func.func @transform_8(%arg0: i32) -> (i32, i32) {
    %c0_i32 = arith.constant 0 : i32
    %c0_i32_0 = arith.constant 0 : i32
    %c0_i32_1 = arith.constant 0 : i32
    return %c0_i32, %c0_i32_0 : i32, i32
  }
  func.func @transform_9(%arg0: i32) -> (i32, i32) {
    %c0_i32 = arith.constant 0 : i32
    %c0_i32_0 = arith.constant 0 : i32
    %c0_i32_1 = arith.constant 0 : i32
    return %c0_i32, %c0_i32_0 : i32, i32
  }
  func.func @transform_10(%arg0: i32) -> (i32, i32) {
    %c0_i32 = arith.constant 0 : i32
    %c0_i32_0 = arith.constant 0 : i32
    %c0_i32_1 = arith.constant 0 : i32
    return %c0_i32, %c0_i32_0 : i32, i32
  }
  func.func @transform_11(%arg0: i32) -> (i32, i32) {
    %c0_i32 = arith.constant 0 : i32
    %c0_i32_0 = arith.constant 0 : i32
    %c0_i32_1 = arith.constant 0 : i32
    return %c0_i32, %c0_i32_0 : i32, i32
  }
}

</mosaic_0001>

<bundles_post_ra>
// kernel: tpu_custom_call.1
= control target key start
LH: loop header
LB: loop body
LE: loop exit
PB: predicated region body
PF: predicated region fallthrough
CT: control target
= control target key end

     0   :  { %16 = vsyncpa [#allocation7], 0  ;;  %s1255_s0 = inlined_call_operand.vmem [shape: f32[32,32], index: 0, kind: input, shape index: {}]   ;;  %s1256_s1 = inlined_call_operand.vmem [shape: bf16[32,16], index: 1, kind: input, shape index: {}]   ;;  %s1257_s2 = inlined_call_operand.vmem [shape: bf16[32,8], index: 2, kind: input, shape index: {}]   ;;  %s1258_s3 = inlined_call_operand.hbm [shape: f32[16,32], index: 3, kind: input, shape index: {}]   ;;  %s1259_s4 = inlined_call_operand.vmem [shape: f32[8,32], index: 4, kind: input, shape index: {}]   ;;  %s1260_s5 = inlined_call_operand.vmem [shape: f32[16,2], index: 5, kind: input, shape index: {}]   ;;  %s1261_s6 = inlined_call_operand.vmem [shape: f32[8,2], index: 6, kind: input, shape index: {}]   ;;  %s1262_s7 = inlined_call_operand.vmem [shape: f32[32,2], index: 7, kind: input, shape index: {}]   ;;  %s1263_s8 = inlined_call_operand.vmem [shape: f32[32,32], index: 8, kind: input, shape index: {}]   ;;  %s1264_s9 = inlined_call_operand.vmem [shape: f32[32,32], index: 9, kind: input, shape index: {}]   ;;  %s1265_s10 = inlined_call_operand.vmem [shape: f32[1,32], index: 10, kind: input, shape index: {}]   ;;  %s1266_s11 = inlined_call_operand.hbm [shape: f32[8,32], index: 11, kind: output, shape index: {}]  }
   0x1   :  { %17 = vsyncpa [#allocation8], 0  ;;  %s28_s19 = sshll.u32 %s1258_s3, 4  ;;  %s934_s20 = smov [#allocation6]   ;;  %s29_s19 = int_to_ptr.hbm [resolvable:$true] %s28_s19 }
   0x2   :  { %s30_s21 = sshll.u32 %s934_s20, 4  ;;  %s935_s22 = smov 128   ;;  %s31_s21 = int_to_ptr.vmem [resolvable:$true] %s30_s21 }
   0x3   :  { %s936_s23 = smov 8  }
   0x4   :  { %36 = dma.hbm_to_vmem [thread:$0]  %s29_s19, 256, %s31_s21, [#allocation7], %s935_s22, %s935_s22, %s936_s23  }
   0x5   :  { %930 = dma.done.wait [#allocation7], 256  }
   0x6   :  { %931 = vsyncadd [#allocation7], 4294967040  ;;  %vm141_vm0 = vcmask 64512   ;;  %v130_v0 = vld [vmem:[%s1259_s4] sm:$0xff]  ;;  %v176_v2 = vld [vmem:[%s1260_s5 + $0x8] sm:$0xff]  ;;  %vm96_vm1 = vcmask 130048  }
   0x7   :  { %v1011_v1 = vld [vmem:[%s1257_s2] sm:$0xff]  ;;  %163 = vmatpush.msra.mxu1 %v130_v0  ;;  %219 = vmatpush.msra.mxu3 %v176_v2  ;;  %v235_v6 = vld [vmem:[%s1262_s7 + $0x18] sm:$0xff]  ;;  %v234_v7 = vld [vmem:[%s1262_s7 + $0x10] sm:$0xff]  ;;  %vm63_vm2 = vcmask 261120   ;;  %v937_v21 = vmov 1   ;;  %v938_v22 = vmov 0  }
   0x8   :  { %v177_v3 = vld [vmem:[%s1261_s6] sm:$0xff]  ;;  %824 = vmatmul.msk.bf16.vlgmr.msra.gmra.mxu1 %vm141_vm0, %v1011_v1  ;;  %v233_v8 = vld [vmem:[%s1262_s7 + $0x8] sm:$0xff]  ;;  %v78_v16 = vld [vmem:[%s1255_s0 + $0x10] sm:$0xff]  ;;  %856 = vset.pattern.permute.xlu2 %v937_v21  ;;  %vm60_vm9 = vcmask 15360   ;;  %vm372_vm12 = vcmask 1040384   ;;  %s796_s27 = sshll.u32 %s1266_s11, 4  ;;  %s797_s27 = int_to_ptr.hbm [resolvable:$true] %s796_s27 }
   0x9   :  { %v175_v4 = vld [vmem:[%s1260_s5] sm:$0xff]  ;;  %193 = vmatpush.msra.mxu2 %v177_v3  ;;  %261 = vmatpush.msrb.mxu1 %v235_v6  ;;  %v1048_v10 = vld [vmem:[%s1257_s2 + $0x8] sm:$0xff]  ;;  %v1078_v17 = vmax.f32 %v78_v16, 0.0  ;;  %v79_v18 = vld [vmem:[%s1255_s0 + $0x18] sm:$0xff] }
   0xa   :  { %v1027_v5 = vld [vmem:[%s1256_s1] sm:$0xff]  ;;  %220 = vmatpush.msra.mxu3 %v175_v4  ;;  %826 = vmatmul.msk.bf16.vlgmr.msra.gmra.mxu2 %vm141_vm0, %v1011_v1  ;;  %v1053_v11 = vld [vmem:[%s1256_s1 + $0x8] sm:$0xff]  ;;  %v1085_v19 = vmax.f32 %v79_v18, 0.0  ;;  %v84_v0 = vld [vmem:[#allocation6] sm:$0xff] }
   0xb   :  { %828 = vmatmul.msk.bf16.vlgmr.msra.gmra.mxu3 %vm96_vm1, %v1027_v5  ;;  %262 = vmatpush.msrb.mxu1 %v234_v7  ;;  %v232_v9 = vld [vmem:[%s1262_s7] sm:$0xff]  ;;  %v77_v14 = vld [vmem:[%s1255_s0 + $0x8] sm:$0xff]  ;;  %v939_v7 = vmov -1e+30  }
   0xc   :  { %v76_v12 = vld [vmem:[%s1255_s0] sm:$0xff]  ;;  %v1071_v15 = vmax.f32 %v77_v14, 0.0  ;;  %855 = vset.pattern.permute.xlu0 %v938_v22  ;;  %857 = vset.pattern.permute.xlu1 %v938_v22  ;;  %v74_v55 = vld [vmem:[%s1257_s2 + $0x8] sm:$0xff]   ;;  %61 = vst.msk [vmem:[#allocation2] sm:$0xff] %vm60_vm9, %v939_v7 }
   0xd   :  { %263 = vmatpush.msrb.mxu1 %v233_v8  ;;  %v1064_v13 = vmax.f32 %v76_v12, 0.0  ;;  %v72_v56 = vld [vmem:[%s1257_s2] sm:$0xff]   ;;  %v296_v58 = vunpack.c.l.bf16 %v74_v55  ;;  %v297_v63 = vunpack.c.h.bf16 %v74_v55 }
   0xe   :  { %v295_v57 = vunpack.c.h.bf16 %v72_v56  ;;  %v294_v61 = vunpack.c.l.bf16 %v72_v56 }
   0xf   :  { %264 = vmatpush.msrb.mxu1 %v232_v9  ;;  %vm1131_vm8 = vcmp.gt.f32.partialorder %v296_v58, 0.0  ;;  %vm1141_vm11 = vcmp.gt.f32.partialorder %v297_v63, 0.0  ;;  %v85_v63 = vld [vmem:[#allocation6 + $0x8] sm:$0xff] }
  0x10   :  { %vm1127_vm7 = vcmp.gt.f32.partialorder %v295_v57, 0.0  ;;  %vm1137_vm10 = vcmp.gt.f32.partialorder %v294_v61, 0.0  ;;  %117 = vmatpush.msra.mxu0 %v85_v63 }
  0x12   :  { %118 = vmatpush.msra.mxu0 %v84_v0 }
  0x13   :  { %814 = vmatmul.msk.bf16.vlgmr.msra.gmra.mxu0 %vm96_vm1, %v1027_v5  ;;  %v406_v2 = vld [vmem:[#allocation2] sm:$0xff] }
  0x18   :  { %825 = vmatmul.msk.bf16.gmra.mxu1 %vm141_vm0, %v1048_v10 }
  0x1a   :  { %827 = vmatmul.msk.bf16.gmra.mxu2 %vm141_vm0, %v1048_v10 }
  0x1b   :  { %829 = vmatmul.msk.bf16.gmra.mxu3 %vm96_vm1, %v1053_v11 }
  0x23   :  { %815 = vmatmul.msk.bf16.gmra.mxu0 %vm96_vm1, %v1053_v11 }
  0x28   :  { %830 = vmatmul.msk.f32.vlgmr.msrb.gmra.mxu1 %vm63_vm2, %v1064_v13 }
  0x30   :  { %831 = vmatmul.msk.f32.gmra.mxu1 %vm63_vm2, %v1071_v15 }
  0x38   :  { %832 = vmatmul.msk.f32.gmra.mxu1 %vm63_vm2, %v1078_v17 }
  0x40   :  { %833 = vmatmul.msk.f32.gmra.mxu1 %vm63_vm2, %v1085_v19 }
  0x85   :  { %v1089_v20 = vpop.f32.mrf.mxu1 }
  0x8d   :  { %v1094_v23 = vpop.f32.mrf.mxu1  ;;  %v195_v25 = vpop.f32.mrf.mxu2 }
  0x8e   :  { %v222_v26 = vpop.f32.mrf.mxu3 }
  0x8f   :  { %v223_v28 = vadd.f32 %v222_v26, %v195_v25 }
  0x95   :  { %v1096_v24 = vpop.f32.mrf.mxu1  ;;  %v197_v29 = vpop.f32.mrf.mxu2 }
  0x96   :  { %v224_v30 = vpop.f32.mrf.mxu3 }
  0x97   :  { %v225_v35 = vadd.f32 %v224_v30, %v197_v29 }
  0x9d   :  { %v1098_v27 = vpop.f32.mrf.mxu1  ;;  %v200_v38 = vpop.f32.mrf.mxu2 }
  0x9e   :  { %v227_v39 = vpop.f32.mrf.mxu3 }
  0x9f   :  { %v228_v41 = vadd.f32 %v227_v39, %v200_v38 }
  0xa5   :  { %v266_v31 = vpop.f32.mrf.mxu1  ;;  %v202_v46 = vpop.f32.mrf.mxu2 }
  0xa6   :  { %v278_v32 = vadd.f32 %v266_v31, %v223_v28  ;;  %v229_v47 = vpop.f32.mrf.mxu3 }
  0xa7   :  { %v230_v49 = vadd.f32 %v229_v47, %v202_v46 }
  0xa8   :  { %v286_v33 = vmul.f32 0.01, %v278_v32  ;;  %vm282_vm3 = vcmp.gt.f32.partialorder %v278_v32, 0.0 }
  0xaa   :  { %v1100_v34 = vsel %vm282_vm3, %v278_v32, %v286_v33 }
  0xab   :  { %340 = vperm.xlu2 %856, %v1100_v34   ;;  %304 = vperm.xlu0 %855, %v1100_v34  }
  0xad   :  { %v269_v36 = vpop.f32.mrf.mxu1 }
  0xae   :  { %v279_v37 = vadd.f32 %v269_v36, %v225_v35 }
  0xb0   :  { %v287_v40 = vmul.f32 0.01, %v279_v37  ;;  %vm283_vm4 = vcmp.gt.f32.partialorder %v279_v37, 0.0 }
  0xb2   :  { %v1104_v42 = vsel %vm283_vm4, %v279_v37, %v287_v40 }
  0xb3   :  { %344 = vperm.xlu2 %856, %v1104_v42   ;;  %309 = vperm.xlu0 %855, %v1104_v42  }
  0xb5   :  { %v272_v43 = vpop.f32.mrf.mxu1 }
  0xb6   :  { %v280_v44 = vadd.f32 %v272_v43, %v228_v41 }
  0xb8   :  { %v288_v45 = vmul.f32 0.01, %v280_v44  ;;  %vm284_vm5 = vcmp.gt.f32.partialorder %v280_v44, 0.0 }
  0xba   :  { %v1108_v48 = vsel %vm284_vm5, %v280_v44, %v288_v45 }
  0xbb   :  { %314 = vperm.xlu1 %857, %v1108_v48   ;;  %858 = vset.pattern.permute.xlu0 %v937_v21 }
  0xbc   :  { %348 = vperm.xlu0 %858, %v1108_v48  }
  0xbd   :  { %v275_v50 = vpop.f32.mrf.mxu1 }
  0xbe   :  { %v281_v51 = vadd.f32 %v275_v50, %v230_v49 }
  0xc0   :  { %v289_v52 = vmul.f32 0.01, %v281_v51  ;;  %vm285_vm6 = vcmp.gt.f32.partialorder %v281_v51, 0.0 }
  0xc2   :  { %v1113_v53 = vsel %vm285_vm6, %v281_v51, %v289_v52 }
  0xc3   :  { %319 = vperm.xlu1 %857, %v1113_v53  }
  0xc4   :  { %861 = vset.pattern.permute.xlu0 %v938_v22 }
  0xcb   :  { %859 = vset.pattern.permute.xlu1 %v937_v21 }
  0xcc   :  { %352 = vperm.xlu1 %859, %v1113_v53  }
 0x101   :  { %456 = vxpose.xlu1.c.b16.start [1/2] (short) (narrow) %v1011_v1, 16 }
 0x105   :  { %v341_v60 = vpop.permute.xlu2 %340 }
 0x106   :  { %v355_v36 = vsel %vm1137_vm10, %v341_v60, -1e+30 }
 0x107   :  { %v359_v43 = vsel %vm141_vm0, %v355_v36, -inf }
 0x10d   :  { %v345_v28 = vpop.permute.xlu2 %344 }
 0x10e   :  { %v356_v33 = vsel %vm1127_vm7, %v345_v28, -1e+30 }
 0x10f   :  { %v360_v38 = vsel %vm141_vm0, %v356_v33, -inf }
 0x110   :  { %v363_v46 = vmax.f32 %v359_v43, %v360_v38  ;;  %v505_v38 = vmul.f32 %v1098_v27, %v1085_v19  ;;  %v504_v43 = vmul.f32 %v1096_v24, %v1078_v17 }
 0x111   :  { %457 = vxpose.xlu1.c.b16.end [2/2] (short) (narrow) %v1048_v10, 16 }
 0x11d   :  { %v305_v54 = vpop.permute.xlu0 %304 }
 0x11e   :  { %v322_v8 = vsel %vm1137_vm10, %v305_v54, -1e+30 }
 0x11f   :  { %v326_v18 = vsel %vm141_vm0, %v322_v8, -inf }
 0x125   :  { %v310_v62 = vpop.permute.xlu0 %309 }
 0x126   :  { %v323_v3 = vsel %vm1127_vm7, %v310_v62, -1e+30  ;;  %v940_v62 = vmov 0.0  }
 0x127   :  { %v327_v12 = vsel %vm141_vm0, %v323_v3, -inf  ;;  %62 = vst.msk [vmem:[#allocation3] sm:$0xff] %vm60_vm9, %v940_v62 }
 0x128   :  { %v330_v29 = vmax.f32 %v326_v18, %v327_v12  ;;  %64 = vst.msk [vmem:[#allocation4] sm:$0xff] %vm63_vm2, %v940_v62 }
 0x129   :  { %65 = vst.msk [vmem:[#allocation4 + $0x8] sm:$0xff] %vm63_vm2, %v940_v62 }
 0x12a   :  { %66 = vst.msk [vmem:[#allocation5] sm:$0xff] %vm63_vm2, %v940_v62 }
 0x12b   :  { %67 = vst.msk [vmem:[#allocation5 + $0x8] sm:$0xff] %vm63_vm2, %v940_v62 }
 0x12d   :  { %v315_v59 = vpop.permute.xlu1 %314 }
 0x12e   :  { %v324_v9 = vsel %vm1131_vm8, %v315_v59, -1e+30  ;;  %v349_v31 = vpop.permute.xlu0 %348 }
 0x12f   :  { %v328_v25 = vsel %vm141_vm0, %v324_v9, -inf  ;;  %v357_v37 = vsel %vm1131_vm8, %v349_v31, -1e+30 }
 0x130   :  { %v361_v44 = vsel %vm141_vm0, %v357_v37, -inf }
 0x135   :  { %v320_v14 = vpop.permute.xlu1 %319 }
 0x136   :  { %v325_v16 = vsel %vm1141_vm11, %v320_v14, -1e+30 }
 0x137   :  { %v329_v26 = vsel %vm141_vm0, %v325_v16, -inf }
 0x138   :  { %v331_v30 = vmax.f32 %v328_v25, %v329_v26 }
 0x13a   :  { %v332_v32 = vmax.f32 %v330_v29, %v331_v30  ;;  %v120_v30 = vpop.f32.mrf.mxu0 }
 0x13c   :  { %v333_v35 = vrot.slane %v332_v32, 4 }
 0x13e   :  { %v353_v39 = vpop.permute.xlu1 %352  ;;  %v334_v40 = vmax.f32 %v332_v32, %v333_v35 }
 0x13f   :  { %v358_v41 = vsel %vm1141_vm11, %v353_v39, -1e+30 }
 0x140   :  { %v362_v45 = vsel %vm141_vm0, %v358_v41, -inf  ;;  %v335_v49 = vrot.slane %v334_v40, 2 }
 0x141   :  { %v364_v47 = vmax.f32 %v361_v44, %v362_v45 }
 0x142   :  { %v336_v54 = vmax.f32 %v334_v40, %v335_v49  ;;  %v122_v32 = vpop.f32.mrf.mxu0  ;;  %v498_v49 = vmul.f32 %v120_v30, %v1064_v13  ;;  %v506_v30 = vld [vmem:[#allocation4] sm:$0xff] }
 0x143   :  { %v365_v50 = vmax.f32 %v363_v46, %v364_v47  ;;  %v503_v46 = vmul.f32 %v1094_v23, %v1071_v15 }
 0x144   :  { %v337_v56 = vrot.slane %v336_v54, 1 }
 0x145   :  { %v366_v51 = vrot.slane %v365_v50, 4 }
 0x146   :  { %v338_v59 = vmax.f32 %v336_v54, %v337_v56 }
 0x147   :  { %v367_v52 = vmax.f32 %v365_v50, %v366_v51  ;;  %v452_v51 = vld [vmem:[#allocation3] sm:$0xff] }
 0x149   :  { %v368_v55 = vrot.slane %v367_v52, 2 }
 0x14a   :  { %v125_v35 = vpop.f32.mrf.mxu0 }
 0x14b   :  { %v369_v57 = vmax.f32 %v367_v52, %v368_v55  ;;  %v500_v39 = vmul.f32 %v125_v35, %v1078_v17  ;;  %v711_v35 = vld [vmem:[%s1263_s8] sm:$0xff] }
 0x14d   :  { %v370_v58 = vrot.slane %v369_v57, 1 }
 0x14f   :  { %v371_v60 = vmax.f32 %v369_v57, %v370_v58 }
 0x151   :  { %v373_v61 = vsel %vm372_vm12, %v338_v59, %v371_v60 }
 0x152   :  { %374 = vxpose.xlu2.b32.start.end [1/1] (short) (narrow) %v373_v61, 8  ;;  %v127_v37 = vpop.f32.mrf.mxu0 }
 0x153   :  { %v501_v40 = vmul.f32 %v127_v37, %v1085_v19  ;;  %v502_v19 = vmul.f32 %v1089_v20, %v1064_v13 }
 0x1ad   :  { %v1188_v29 = vpop.trf.xlu1 }
 0x1b4   :  { %860 = vset.pattern.permute.xlu2 %v938_v22 }
 0x1eb   :  { %v390_v3 = vpop.trf.xlu2 }
 0x1ec   :  { %v407_v4 = vmax.f32 %v406_v2, %v390_v3 }
 0x1ee   :  { %v408_v6 = vsub.f32 %v406_v2, %v407_v4  ;;  %412 = vst.msk [vmem:[#allocation2] sm:$0xff] %vm60_vm9, %v407_v4  ;;  %428 = vmatpush.msrb.mxu2 %v407_v4 }
 0x1ef   :  { %834 = vmatmul.msk.bf16.vlgmr.msrb.gmra.mxu2 %vm141_vm0, %v1011_v1 }
 0x1ff   :  { %835 = vmatmul.msk.bf16.gmra.mxu2 %vm141_vm0, %v1048_v10 }
 0x272   :  { %v430_v7 = vpop.f32.mrf.mxu2 }
 0x273   :  { %v440_v8 = vsub.f32 %v1100_v34, %v430_v7 }
 0x275   :  { %v444_v5 = vmul.f32 1.442695, %v440_v8 }
 0x277   :  { %868 = vpow2.f32 %v444_v5 }
 0x27a   :  { %v432_v9 = vpop.f32.mrf.mxu2 }
 0x27b   :  { %v441_v12 = vsub.f32 %v1104_v42, %v432_v9 }
 0x27d   :  { %v869_v14 = vpop.eup %868  ;;  %v446_v16 = vmul.f32 1.442695, %v441_v12 }
 0x27e   :  { %597 = vperm.xlu1 %859, %v869_v14   ;;  %515 = vperm.xlu0 %861, %v869_v14  }
 0x27f   :  { %870 = vpow2.f32 %v446_v16 }
 0x282   :  { %v435_v1 = vpop.f32.mrf.mxu2 }
 0x283   :  { %v442_v18 = vsub.f32 %v1108_v48, %v435_v1  ;;  %v409_v48 = vmul.f32 1.442695, %v408_v6 }
 0x285   :  { %v871_v11 = vpop.eup %870  ;;  %v448_v25 = vmul.f32 1.442695, %v442_v18 }
 0x286   :  { %520 = vperm.xlu2 %860, %v871_v11  }
 0x287   :  { %872 = vpow2.f32 %v448_v25  ;;  %v718_v25 = vld [vmem:[%s1264_s9 + $0x18] sm:$0xff] }
 0x288   :  { %734 = vmatpush.msra.mxu2 %v718_v25 }
 0x28a   :  { %v437_v10 = vpop.f32.mrf.mxu2 }
 0x28b   :  { %v443_v34 = vsub.f32 %v1113_v53, %v437_v10  ;;  %v717_v10 = vld [vmem:[%s1264_s9 + $0x10] sm:$0xff] }
 0x28c   :  { %735 = vmatpush.msra.mxu2 %v717_v10 }
 0x28d   :  { %v873_v26 = vpop.eup %872  ;;  %v450_v28 = vmul.f32 1.442695, %v443_v34  ;;  %v560_v34 = vld [vmem:[#allocation5] sm:$0xff] }
 0x28e   :  { %525 = vperm.xlu0 %861, %v873_v26  }
 0x28f   :  { %874 = vpow2.f32 %v450_v28  ;;  %v716_v28 = vld [vmem:[%s1264_s9 + $0x8] sm:$0xff] }
 0x290   :  { %876 = vpow2.f32 %v409_v48  ;;  %736 = vmatpush.msra.mxu2 %v716_v28  ;;  %v714_v48 = vld [vmem:[%s1263_s8 + $0x18] sm:$0xff] }
 0x295   :  { %v875_v42 = vpop.eup %874 }
 0x296   :  { %862 = vset.pattern.permute.xlu0 %v937_v21  ;;  %487 = vmatpush.msrb.mxu0 %v875_v42  ;;  %v877_v53 = vpop.eup %876 }
 0x297   :  { %605 = vperm.xlu0 %862, %v873_v26   ;;  %v453_v54 = vmul.f32 %v877_v53, %v452_v51 }
 0x298   :  { %488 = vmatpush.msrb.mxu0 %v873_v26 }
 0x29a   :  { %489 = vmatpush.msrb.mxu0 %v871_v11 }
 0x29c   :  { %490 = vmatpush.msrb.mxu0 %v869_v14 }
 0x29d   :  { %836 = vmatmul.msk.bf16.vlgmr.msrb.gmra.mxu0 %vm63_vm2, %v1188_v29 }
 0x29f   :  { %863 = vset.pattern.permute.xlu0 %v938_v22 }
 0x2a0   :  { %530 = vperm.xlu0 %863, %v875_v42  }
 0x2a8   :  { %864 = vset.pattern.permute.xlu0 %v937_v21 }
 0x2a9   :  { %609 = vperm.xlu0 %864, %v875_v42   ;;  %v715_v42 = vld [vmem:[%s1264_s9] sm:$0xff] }
 0x2aa   :  { %737 = vmatpush.msra.mxu2 %v715_v42 }
 0x2b1   :  { %601 = vperm.xlu0 %864, %v871_v11  }
 0x2b9   :  { %592 = vperm.xlu0 %864, %v877_v53  }
 0x2c1   :  { %865 = vset.pattern.permute.xlu0 %v938_v22  ;;  %v499_v22 = vmul.f32 %v122_v32, %v1071_v15  ;;  %v712_v32 = vld [vmem:[%s1263_s8 + $0x8] sm:$0xff] }
 0x2c2   :  { %509 = vperm.xlu0 %865, %v877_v53  }
 0x2e0   :  { %v521_v47 = vpop.permute.xlu2 %520 }
 0x2e1   :  { %v563_v52 = vmul.f32 %v521_v47, %v503_v46  ;;  %v534_v17 = vmul.f32 %v521_v47, %v499_v22 }
 0x2f0   :  { %v516_v31 = vpop.permute.xlu0 %515  ;;  %v598_v60 = vpop.permute.xlu1 %597 }
 0x2f1   :  { %v562_v24 = vmul.f32 %v516_v31, %v502_v19  ;;  %v533_v15 = vmul.f32 %v516_v31, %v498_v49  ;;  %v612_v2 = vmul.f32 %v598_v60, %v498_v49  ;;  %v642_v3 = vmul.f32 %v598_v60, %v502_v19  ;;  %v713_v31 = vld [vmem:[%s1263_s8 + $0x10] sm:$0xff] }
 0x300   :  { %v526_v33 = vpop.permute.xlu0 %525 }
 0x301   :  { %v564_v50 = vmul.f32 %v526_v33, %v504_v43  ;;  %v535_v27 = vmul.f32 %v526_v33, %v500_v39 }
 0x309   :  { %v606_v36 = vpop.permute.xlu0 %605 }
 0x30a   :  { %v614_v13 = vmul.f32 %v606_v36, %v500_v39  ;;  %v644_v20 = vmul.f32 %v606_v36, %v504_v43  ;;  %v640_v39 = vld [vmem:[#allocation5 + $0x8] sm:$0xff] }
 0x312   :  { %v531_v41 = vpop.permute.xlu0 %530 }
 0x313   :  { %v565_v44 = vmul.f32 %v531_v41, %v505_v38  ;;  %v536_v45 = vmul.f32 %v531_v41, %v501_v40 }
 0x315   :  { %549 = vmatpush.msrb.mxu3 %v536_v45  ;;  %578 = vmatpush.msra.mxu0 %v565_v44  ;;  %v590_v45 = vld [vmem:[#allocation4 + $0x8] sm:$0xff] }
 0x317   :  { %550 = vmatpush.msrb.mxu3 %v535_v27  ;;  %579 = vmatpush.msra.mxu0 %v564_v50 }
 0x319   :  { %551 = vmatpush.msrb.mxu3 %v534_v17  ;;  %580 = vmatpush.msra.mxu0 %v563_v52 }
 0x31a   :  { %v492_v23 = vpop.f32.mrf.mxu0 }
 0x31b   :  { %v496_v55 = vadd.f32 %v492_v23, %v453_v54  ;;  %552 = vmatpush.msrb.mxu3 %v533_v15  ;;  %v610_v56 = vpop.permute.xlu0 %609  ;;  %581 = vmatpush.msra.mxu0 %v562_v24 }
 0x31c   :  { %v615_v57 = vmul.f32 %v610_v56, %v501_v40  ;;  %v645_v58 = vmul.f32 %v610_v56, %v505_v38  ;;  %837 = vmatmul.msk.bf16.vlgmr.msrb.gmra.mxu3 %vm63_vm2, %v1188_v29  ;;  %838 = vmatmul.msk.bf16.vlgmr.msra.gmra.mxu0 %vm63_vm2, %v1188_v29 }
 0x31d   :  { %497 = vst.msk [vmem:[#allocation3] sm:$0xff] %vm60_vm9, %v496_v55  ;;  %757 = vmatpush.msrb.mxu0 %v714_v48 }
 0x31e   :  { %628 = vmatpush.msra.mxu3 %v615_v57  ;;  %658 = vmatpush.msra.mxu1 %v645_v58 }
 0x31f   :  { %758 = vmatpush.msrb.mxu0 %v713_v31 }
 0x320   :  { %629 = vmatpush.msra.mxu3 %v614_v13  ;;  %659 = vmatpush.msra.mxu1 %v644_v20 }
 0x321   :  { %759 = vmatpush.msrb.mxu0 %v712_v32 }
 0x322   :  { %v494_v59 = vpop.f32.mrf.mxu0 }
 0x323   :  { %v602_v61 = vpop.permute.xlu0 %601  ;;  %760 = vmatpush.msrb.mxu0 %v711_v35  ;;  %v867_v59 = vld [vmem:[%s1265_s10] ss:$0 sm:$0xff]  ;;  %s941_s10 = smov [#allocation9]  }
 0x324   :  { %v613_v62 = vmul.f32 %v602_v61, %v499_v22  ;;  %v643_v63 = vmul.f32 %v602_v61, %v503_v46  ;;  %v672_v0 = vld [vmem:[#allocation3] sm:$0xff]  ;;  %s794_s25 = sshll.u32 %s941_s10, 4  ;;  %s795_s25 = int_to_ptr.vmem [resolvable:$true] %s794_s25 }
 0x325   :  { %878 = vrcp.f32 %v672_v0  ;;  %v685_v8 = vand.u32 2147483648, %v672_v0  ;;  %v683_v9 = vand.u32 2147483647, %v672_v0  ;;  %vm679_vm14 = vweird.f32 %v672_v0 }
 0x326   :  { %630 = vmatpush.msra.mxu3 %v613_v62  ;;  %660 = vmatpush.msra.mxu1 %v643_v63  ;;  %vm673_vm1 = vcmp.gt.f32.partialorder %v672_v0, 0.0 }
 0x327   :  { %v686_v14 = vor.u32 1.1754944e-38, %v685_v8  ;;  %vm684_vm0 = vcmp.eq.f32.partialorder %v683_v9, 8.507059e+37 }
 0x328   :  { %631 = vmatpush.msra.mxu3 %v612_v2  ;;  %661 = vmatpush.msra.mxu1 %v642_v3 }
 0x329   :  { %840 = vmatmul.msk.bf16.vlgmr.msra.gmra.mxu1 %vm63_vm2, %v1188_v29 }
 0x32b   :  { %v879_v4 = vpop.eup %878  ;;  %v593_v11 = vpop.permute.xlu0 %592 }
 0x32c   :  { %839 = vmatmul.msk.bf16.vlgmr.msra.gmra.mxu3 %vm63_vm2, %v1188_v29  ;;  %v675_v6 = vmul.f32 %v879_v4, %v672_v0  ;;  %vm680_vm13 = vweird.f32 %v879_v4  ;;  %v641_v40 = vmul.f32 %v640_v39, %v593_v11  ;;  %v595_v46 = vmul.f32 %v593_v11, %v590_v45 }
 0x32d   :  { %vm681_vm15 = vmor %vm679_vm14, %vm680_vm13 }
 0x32e   :  { %v676_v7 = vsub.f32 1.0, %v675_v6 }
 0x330   :  { %v677_v5 = vmul.f32 %v879_v4, %v676_v7 }
 0x332   :  { %v678_v12 = vadd.f32 %v879_v4, %v677_v5 }
 0x334   :  { %v682_v16 = vsel %vm681_vm15, %v879_v4, %v678_v12  ;;  %v510_v26 = vpop.permute.xlu0 %509 }
 0x335   :  { %v687_v1 = vsel %vm684_vm0, %v686_v14, %v682_v16  ;;  %v512_v33 = vmul.f32 %v510_v26, %v506_v30 }
 0x336   :  { %v689_v18 = vsel %vm673_vm1, %v687_v1, 0.0 }
 0x337   :  { %693 = vperm.xlu0 %865, %v689_v18  }
 0x33f   :  { %866 = vset.pattern.permute.xlu0 %v937_v21  ;;  %v561_v21 = vmul.f32 %v560_v34, %v510_v26 }
 0x340   :  { %701 = vperm.xlu0 %866, %v689_v18  }
 0x399   :  { %v583_v29 = vpop.f32.mrf.mxu0 }
 0x39a   :  { %v587_v53 = vadd.f32 %v583_v29, %v561_v21 }
 0x39c   :  { %588 = vst.msk [vmem:[#allocation5] sm:$0xff] %vm63_vm2, %v587_v53 }
 0x39f   :  { %v554_v36 = vpop.f32.mrf.mxu3 }
 0x3a0   :  { %v558_v37 = vadd.f32 %v554_v36, %v512_v33 }
 0x3a1   :  { %v585_v38 = vpop.f32.mrf.mxu0 }
 0x3a2   :  { %559 = vst.msk [vmem:[#allocation4] sm:$0xff] %vm63_vm2, %v558_v37 }
 0x3a3   :  { %v697_v27 = vld [vmem:[#allocation5] sm:$0xff] }
 0x3a6   :  { %v663_v41 = vpop.f32.mrf.mxu1 }
 0x3a7   :  { %v667_v43 = vadd.f32 %v663_v41, %v641_v40  ;;  %v556_v22 = vpop.f32.mrf.mxu3 }
 0x3a9   :  { %668 = vst.msk [vmem:[#allocation5 + $0x8] sm:$0xff] %vm63_vm2, %v667_v43  ;;  %v694_v44 = vpop.permute.xlu0 %693  ;;  %v690_v54 = vld [vmem:[#allocation4] sm:$0xff] }
 0x3aa   :  { %v698_v52 = vmul.f32 %v697_v27, %v694_v44  ;;  %v696_v56 = vmul.f32 %v694_v44, %v690_v54 }
 0x3ae   :  { %v665_v47 = vpop.f32.mrf.mxu1 }
 0x3af   :  { %v633_v49 = vpop.f32.mrf.mxu3 }
 0x3b0   :  { %v637_v50 = vadd.f32 %v633_v49, %v595_v46  ;;  %v706_v51 = vld [vmem:[#allocation5 + $0x8] sm:$0xff] }
 0x3b2   :  { %638 = vst.msk [vmem:[#allocation4 + $0x8] sm:$0xff] %vm63_vm2, %v637_v50  ;;  %v702_v19 = vpop.permute.xlu0 %701 }
 0x3b3   :  { %v707_v17 = vmul.f32 %v706_v51, %v702_v19 }
 0x3b5   :  { %v708_v24 = vadd.f32 %v707_v17, %v698_v52 }
 0x3b7   :  { %v710_v15 = vmul.f32 0.015625, %v708_v24  ;;  %v635_v23 = vpop.f32.mrf.mxu3 }
 0x3b9   :  { %v699_v55 = vld [vmem:[#allocation4 + $0x8] sm:$0xff]  ;;  %841 = vmatmul.msk.f32.vlgmr.msra.gmra.mxu2 %vm63_vm2, %v710_v15 }
 0x3ba   :  { %v704_v57 = vmul.f32 %v702_v19, %v699_v55 }
 0x3bc   :  { %v705_v58 = vadd.f32 %v704_v57, %v696_v56 }
 0x3be   :  { %v709_v13 = vmul.f32 0.015625, %v705_v58 }
 0x3c0   :  { %842 = vmatmul.msk.f32.vlgmr.msrb.gmra.mxu0 %vm63_vm2, %v709_v13 }
 0x43c   :  { %v739_v20 = vpop.f32.mrf.mxu2 }
 0x43d   :  { %v762_v60 = vpop.f32.mrf.mxu0 }
 0x43e   :  { %v763_v61 = vadd.f32 %v762_v60, %v739_v20 }
 0x440   :  { %v769_v62 = vadd.f32 %v867_v59, %v763_v61 }
 0x442   :  { %v770_v63 = vmax.f32 %v769_v62, 0.0 }
 0x444   :  { %v771_v0 = vmul.f32 %v770_v63, %v770_v63 }
 0x446   :  { %v772_v2 = vsel %vm63_vm2, %v771_v0, 0.0 }
 0x447   :  { %773 = vadd.xlane.f32.xlu2 %v772_v2 }
 0x4ba   :  { %v774_v3 = vpop.xlane.xlu2 %773 }
 0x4bb   :  { %880 = vrsqrt.f32 %v774_v3  ;;  %vm782_vm4 = vweird.f32 %v774_v3  ;;  %vm775_vm6 = vcmp.gt.f32.partialorder %v774_v3, 0.0 }
 0x4c1   :  { %v881_v4 = vpop.eup %880 }
 0x4c2   :  { %v777_v6 = vmul.f32 %v881_v4, %v774_v3  ;;  %vm783_vm3 = vweird.f32 %v881_v4 }
 0x4c3   :  { %vm784_vm5 = vmor %vm782_vm4, %vm783_vm3 }
 0x4c4   :  { %v778_v7 = vmul.f32 %v881_v4, %v777_v6 }
 0x4c6   :  { %v779_v8 = vmul.f32 0.5, %v778_v7 }
 0x4c8   :  { %v780_v5 = vsub.f32 1.5, %v779_v8 }
 0x4ca   :  { %v781_v9 = vmul.f32 %v881_v4, %v780_v5 }
 0x4cc   :  { %v785_v12 = vsel %vm784_vm5, %v881_v4, %v781_v9 }
 0x4cd   :  { %v786_v14 = vsel %vm775_vm6, %v785_v12, 1.0 }
 0x4ce   :  { %v787_v16 = vmul.f32 %v786_v14, %v770_v63 }
 0x4d0   :  { %788 = vst.msk [vmem:[#allocation9] sm:$0xff] %vm63_vm2, %v787_v16 }
 0x4d1   :  { %799 = dma.vmem_to_hbm [thread:$0]  %s795_s25, 128, %s797_s27, [#allocation8]  }
 0x4d2   :  { %932 = dma.done.wait [#allocation8], 128  }
 0x4d3   :  { %933 = vsyncadd [#allocation8], 4294967168 }
 0x4d4   :  { %804 = vsyncpa [#allocation7], 1 }
 0x4d5   :  { %805 = vsyncpa [#allocation8], 1 }

</bundles_post_ra>
